<compile_context>
chip_gen: v6e
topology: v6e:2x2x1
jax: 0.10.0
libtpu: 0.0.40
codegen_flags: <defaults>
</compile_context>

<pallas_src>
import functools

import jax
import jax.numpy as jnp
from jax.experimental import pallas as pl
from jax.experimental.pallas import tpu as pltpu


def edl_partial_kernel(logits_ref, label_ref, out_ref, *, batch_size):
    pid = pl.program_id(0)
    tb, c = logits_ref.shape

    # Global row ids of this tile; rows >= batch_size belong to the ragged
    # last block and must not contribute.
    row_ids = pid * tb + jax.lax.broadcasted_iota(jnp.int32, (tb, 1), 0)
    row_mask = row_ids < batch_size                                    # (tb, 1)

    logits = logits_ref[...].astype(jnp.float32)                       # (tb, c)
    labels = label_ref[...]                                            # (tb, 1) i32

    # alpha = relu(logits) + 1
    alpha = jnp.maximum(logits, 0.0) + 1.0

    # one_hot membership mask (no explicit float one_hot needed).
    class_ids = jax.lax.broadcasted_iota(jnp.int32, (tb, c), 1)
    is_target = class_ids == labels                                    # (tb, c)

    # Three per-row (XLU) reductions; everything else is per-row scalar math.
    S = jnp.sum(alpha, axis=1, keepdims=True)                          # (tb, 1)
    sum_alpha2 = jnp.sum(alpha * alpha, axis=1, keepdims=True)         # (tb, 1)
    alpha_at_label = jnp.sum(
        jnp.where(is_target, alpha, 0.0), axis=1, keepdims=True)       # (tb, 1)

    inv_S = 1.0 / S                                                    # exact
    sum_p2 = sum_alpha2 * (inv_S * inv_S)                              # sum(p^2)
    p_at_label = alpha_at_label * inv_S                                # p[label]

    # err = sum((one_hot - p)^2) = 1 - 2*p[label] + sum(p^2)
    err = 1.0 - 2.0 * p_at_label + sum_p2
    # var = sum(alpha*(S-alpha)) / (S^2*(S+1)) = (1 - sum(p^2)) / (S+1)
    var = (1.0 - sum_p2) / (S + 1.0)

    per_row = jnp.where(row_mask, err + var, 0.0)                      # (tb, 1)
    partial = jnp.sum(per_row)                                         # scalar

    # Lane-dense per-block output: one unmasked vreg store of the partial sum.
    out_ref[...] = jnp.full(out_ref.shape, partial, jnp.float32)


def edl_loss(vqa_logits, label, num_classes, *, block_rows=1024):
    """vqa_logits: (B, num_classes) float (f32/bf16); label: (B,) int. Returns scalar f32."""
    B, C = vqa_logits.shape
    assert C == num_classes
    label2d = label.astype(jnp.int32).reshape(B, 1)

    # Tile sizing: keep the double-buffered logits input under ~24 MiB so the
    # same tile fits v5e/v6e (128 MiB) and v7x (64 MiB/TC) VMEM with headroom.
    itemsize = jnp.dtype(vqa_logits.dtype).itemsize
    vmem_budget = 24 * 1024 * 1024
    tb_cap = max(16, (vmem_budget // (2 * C * itemsize)) // 16 * 16)
    tb = min(block_rows, tb_cap)
    if B <= tb:
        tb = B                      # single block; full-dim block is always legal
    else:
        tb = max(16, (tb // 16) * 16)  # multiple of 16 (covers bf16 (16,128) tiles)
    grid_n = pl.cdiv(B, tb)

    kernel = functools.partial(edl_partial_kernel, batch_size=B)

    out = pl.pallas_call(
        kernel,
        out_shape=jax.ShapeDtypeStruct((grid_n, 8, 128), jnp.float32),
        grid_spec=pltpu.PrefetchScalarGridSpec(
            num_scalar_prefetch=0,
            grid=(grid_n,),
            in_specs=[
                pl.BlockSpec((tb, C), lambda i: (i, 0)),
                pl.BlockSpec((tb, 1), lambda i: (i, 0)),
            ],
            out_specs=pl.BlockSpec((1, 8, 128), lambda i: (i, 0, 0)),
        ),
        compiler_params=pltpu.CompilerParams(
            # Independent per-block partials: shard across TensorCores (v7x).
            dimension_semantics=("parallel",),
            vmem_limit_bytes=48 * 1024 * 1024,
        ),
        cost_estimate=pl.CostEstimate(
            flops=7 * B * C,
            transcendentals=0,
            bytes_accessed=B * C * itemsize + 4 * B + grid_n * 8 * 128 * 4,
        ),
    )(vqa_logits, label2d)

    # Finish the mean in the wrapper (tiny: grid_n scalars).
    return jnp.sum(out[:, 0, 0]) * jnp.float32(1.0 / B)


def edl_loss_ref(vqa_logits, label, num_classes):
    """Pure-JAX reference mirroring the PyTorch module (exact divides)."""
    target = jax.nn.one_hot(label, num_classes, dtype=jnp.float32)
    evidence = jax.nn.relu(vqa_logits.astype(jnp.float32))
    alpha = evidence + 1.0
    S = jnp.sum(alpha, axis=1, keepdims=True)
    err = jnp.sum((target - alpha / S) ** 2, axis=1, keepdims=True)
    var = jnp.sum(alpha * (S - alpha) / (S * S * (S + 1.0)), axis=1, keepdims=True)
    return jnp.mean(err + var)


if __name__ == "__main__":
    key = jax.random.PRNGKey(0)

    # Small shape consistent with the module: 8 VQA samples, 16 answer classes.
    B, C = 8, 16
    k1, k2, k3, k4 = jax.random.split(key, 4)
    vqa_logits = jax.random.normal(k1, (B, C), dtype=jnp.float32)
    label = jax.random.randint(k2, (B,), 0, C, dtype=jnp.int32)

    loss = jax.block_until_ready(edl_loss(vqa_logits, label, C))
    ref = edl_loss_ref(vqa_logits, label, C)
    assert jnp.allclose(loss, ref, atol=1e-4, rtol=1e-4), (loss, ref)

    # Larger case exercising the multi-block parallel grid + ragged last tile.
    B2, C2 = 520, 96
    vqa_logits2 = jax.random.normal(k3, (B2, C2), dtype=jnp.float32)
    label2 = jax.random.randint(k4, (B2,), 0, C2, dtype=jnp.int32)

    loss2 = jax.block_until_ready(edl_loss(vqa_logits2, label2, C2, block_rows=128))
    ref2 = edl_loss_ref(vqa_logits2, label2, C2)
    assert jnp.allclose(loss2, ref2, atol=1e-4, rtol=1e-4), (loss2, ref2)

    # bf16 logits path (upcast inside the kernel).
    logits_bf16 = vqa_logits2.astype(jnp.bfloat16)
    loss3 = jax.block_until_ready(edl_loss(logits_bf16, label2, C2, block_rows=64))
    ref3 = edl_loss_ref(logits_bf16, label2, C2)
    assert jnp.allclose(loss3, ref3, atol=1e-4, rtol=1e-4), (loss3, ref3)

    print("KERNEL_OK")
</pallas_src>

<mosaic_0001>
module attributes {stable_mosaic.version = 11 : i64} {
  func.func @edl_partial_kernel(%arg0: i32, %arg1: memref<8x16xf32, #tpu.memory_space<vmem>>, %arg2: memref<8x1xi32, #tpu.memory_space<vmem>>, %arg3: memref<1x8x128xf32, #tpu.memory_space<vmem>>) attributes {dimension_semantics = [#tpu.dimension_semantics<parallel>], iteration_bounds = array<i64: 1>, scalar_prefetch = 0 : i64, scratch_operands = 0 : i64, tpu.core_type = #tpu.core_type<tc>, window_params = [{transform_indices = @transform_0, window_bounds = array<i64: 8, 16>}, {transform_indices = @transform_1, window_bounds = array<i64: 8, 1>}, {transform_indices = @transform_2, window_bounds = array<i64: 1, 8, 128>}]} {
    %c8_i32 = arith.constant 8 : i32
    %0 = arith.muli %arg0, %c8_i32 : i32
    %1 = tpu.iota {dimensions = array<i32: 0>} : vector<8x1xi32>
    %2 = vector.broadcast %0 : i32 to vector<8x1xi32>
    %3 = arith.addi %2, %1 : vector<8x1xi32>
    %c8_i32_0 = arith.constant 8 : i32
    %4 = vector.broadcast %c8_i32_0 : i32 to vector<8x1xi32>
    %5 = arith.cmpi slt, %3, %4 : vector<8x1xi32>
    %c0 = arith.constant 0 : index
    %c0_1 = arith.constant 0 : index
    %6 = vector.load %arg1[%c0, %c0_1] : memref<8x16xf32, #tpu.memory_space<vmem>>, vector<8x16xf32>
    %c0_2 = arith.constant 0 : index
    %c0_3 = arith.constant 0 : index
    %7 = vector.load %arg2[%c0_2, %c0_3] : memref<8x1xi32, #tpu.memory_space<vmem>>, vector<8x1xi32>
    %cst = arith.constant 0.000000e+00 : f32
    %8 = vector.broadcast %cst : f32 to vector<8x16xf32>
    %9 = arith.maximumf %6, %8 : vector<8x16xf32>
    %cst_4 = arith.constant 1.000000e+00 : f32
    %10 = vector.broadcast %cst_4 : f32 to vector<8x16xf32>
    %11 = arith.addf %9, %10 : vector<8x16xf32>
    %12 = tpu.iota {dimensions = array<i32: 1>} : vector<8x16xi32>
    %13 = vector.broadcast %7 : vector<8x1xi32> to vector<8x16xi32>
    %14 = arith.cmpi eq, %12, %13 : vector<8x16xi32>
    %cst_5 = arith.constant dense<0.000000e+00> : vector<8xf32>
    %15 = vector.multi_reduction <add>, %11, %cst_5 [1] : vector<8x16xf32> to vector<8xf32>
    %16 = vector.shape_cast %15 : vector<8xf32> to vector<8x1xf32>
    %17 = arith.mulf %11, %11 : vector<8x16xf32>
    %cst_6 = arith.constant dense<0.000000e+00> : vector<8xf32>
    %18 = vector.multi_reduction <add>, %17, %cst_6 [1] : vector<8x16xf32> to vector<8xf32>
    %19 = vector.shape_cast %18 : vector<8xf32> to vector<8x1xf32>
    %cst_7 = arith.constant 0.000000e+00 : f32
    %20 = vector.broadcast %cst_7 : f32 to vector<8x16xf32>
    %21 = arith.select %14, %11, %20 : vector<8x16xi1>, vector<8x16xf32>
    %cst_8 = arith.constant dense<0.000000e+00> : vector<8xf32>
    %22 = vector.multi_reduction <add>, %21, %cst_8 [1] : vector<8x16xf32> to vector<8xf32>
    %23 = vector.shape_cast %22 : vector<8xf32> to vector<8x1xf32>
    %cst_9 = arith.constant 1.000000e+00 : f32
    %24 = vector.broadcast %cst_9 : f32 to vector<8x1xf32>
    %25 = arith.divf %24, %16 : vector<8x1xf32>
    %26 = arith.mulf %25, %25 : vector<8x1xf32>
    %27 = arith.mulf %19, %26 : vector<8x1xf32>
    %28 = arith.mulf %23, %25 : vector<8x1xf32>
    %cst_10 = arith.constant 2.000000e+00 : f32
    %29 = vector.broadcast %cst_10 : f32 to vector<8x1xf32>
    %30 = arith.mulf %29, %28 : vector<8x1xf32>
    %cst_11 = arith.constant 1.000000e+00 : f32
    %31 = vector.broadcast %cst_11 : f32 to vector<8x1xf32>
    %32 = arith.subf %31, %30 : vector<8x1xf32>
    %33 = arith.addf %32, %27 : vector<8x1xf32>
    %cst_12 = arith.constant 1.000000e+00 : f32
    %34 = vector.broadcast %cst_12 : f32 to vector<8x1xf32>
    %35 = arith.subf %34, %27 : vector<8x1xf32>
    %cst_13 = arith.constant 1.000000e+00 : f32
    %36 = vector.broadcast %cst_13 : f32 to vector<8x1xf32>
    %37 = arith.addf %16, %36 : vector<8x1xf32>
    %38 = arith.divf %35, %37 : vector<8x1xf32>
    %39 = arith.addf %33, %38 : vector<8x1xf32>
    %cst_14 = arith.constant 0.000000e+00 : f32
    %40 = vector.broadcast %cst_14 : f32 to vector<8x1xf32>
    %41 = arith.select %5, %39, %40 : vector<8x1xi1>, vector<8x1xf32>
    %42 = vector.shape_cast %41 : vector<8x1xf32> to vector<1x8x1xf32>
    %cst_15 = arith.constant dense<0.000000e+00> : vector<1xf32>
    %43 = vector.multi_reduction <add>, %42, %cst_15 [1, 2] : vector<1x8x1xf32> to vector<1xf32>
    %44 = vector.shape_cast %43 : vector<1xf32> to vector<1x1x1xf32>
    %45 = vector.extract %44[0, 0, 0] : f32 from vector<1x1x1xf32>
    %46 = vector.broadcast %45 : f32 to vector<1x8x128xf32>
    %c0_16 = arith.constant 0 : index
    %c0_17 = arith.constant 0 : index
    %c0_18 = arith.constant 0 : index
    %47 = vector.load %arg3[%c0_16, %c0_17, %c0_18] : memref<1x8x128xf32, #tpu.memory_space<vmem>>, vector<1x8x128xf32>
    tpu.vector_store %arg3[%c0_16, %c0_17, %c0_18], %46 {strides = array<i32>} : memref<1x8x128xf32, #tpu.memory_space<vmem>>, vector<1x8x128xf32>,
    return
  }
  func.func @transform_0(%arg0: i32) -> (i32, i32) {
    %c0_i32 = arith.constant 0 : i32
    %c0_i32_0 = arith.constant 0 : i32
    return %arg0, %c0_i32 : i32, i32
  }
  func.func @transform_1(%arg0: i32) -> (i32, i32) {
    %c0_i32 = arith.constant 0 : i32
    %c0_i32_0 = arith.constant 0 : i32
    return %arg0, %c0_i32 : i32, i32
  }
  func.func @transform_2(%arg0: i32) -> (i32, i32, i32) {
    %c0_i32 = arith.constant 0 : i32
    %c0_i32_0 = arith.constant 0 : i32
    %c0_i32_1 = arith.constant 0 : i32
    return %arg0, %c0_i32, %c0_i32_0 : i32, i32, i32
  }
}

</mosaic_0001>

<bundles_post_ra>
// kernel: tpu_custom_call.1
= control target key start
LH: loop header
LB: loop body
LE: loop exit
PB: predicated region body
PF: predicated region fallthrough
CT: control target
= control target key end

     0   :  { %s138_s0 = inlined_call_operand.vmem [shape: f32[8,16], index: 0, kind: input, shape index: {}]   ;;  %s139_s1 = inlined_call_operand.vmem [shape: s32[8,1], index: 1, kind: input, shape index: {}]   ;;  %s140_s2 = inlined_call_operand.hbm [shape: f32[1,8,128], index: 2, kind: output, shape index: {}]  }
   0x1   :  { %v19_v0 = vld [vmem:[%s139_s1] sm:$0xff] }
   0x2   :  { %7 = vsyncpa [#allocation3], 0  ;;  %v112_v1 = vmov 0   ;;  %v18_v2 = vld [vmem:[%s138_s0] sm:$0xff]  ;;  %vm28_vm0 = vcmask 130048   ;;  %v22_v6 = vlaneseq  ;;  %vm54_vm2 = vcmask 7168  }
   0x3   :  { %85 = vset.pattern.permute.xlu0 %v112_v1  ;;  %v20_v3 = vmax.f32 %v18_v2, 0.0  ;;  %s113_s0 = smov [#allocation2]  }
   0x4   :  { %25 = vperm.xlu0 %85, %v19_v0   ;;  %v23_v7 = vand.u32 127, %v22_v6  ;;  %s73_s1 = sshll.u32 %s113_s0, 4  ;;  %s74_s1 = int_to_ptr.vmem [resolvable:$true] %s73_s1 }
   0x5   :  { %v21_v4 = vadd.f32 1.0, %v20_v3  ;;  %s90_s14 = scalar_lea.vmem %s74_s1, 128  ;;  %p95_p1 = scmp.lt.s32.totalorder %s74_s1, %s74_s1 }
   0x6   :  { %p91_p0 = scmp.ne.s32.totalorder %s74_s1, %s90_s14  ;;  %p96_p2 = scmp.lt.s32.totalorder %s90_s14, %s90_s14 }
   0x7   :  { %v29_v5 = vsel %vm28_vm0, %v21_v4, 0.0  ;;  %v32_v9 = vmul.f32 %v21_v4, %v21_v4 }
   0x8   :  { %p97_p3 = por %p96_p2, %p95_p1 }
   0x9   :  { %v33_v12 = vsel %vm28_vm0, %v32_v9, 0.0 }
   0xa   :  { %p98_p4 = pnand %p97_p3, %p91_p0 }
  0x23   :  { %30 = vadd.xlane.f32.xlu0 %v29_v5 }
  0x7f   :  { %v26_v8 = vpop.permute.xlu0 %25 }
  0x80   :  { %vm27_vm1 = vcmp.eq.s32.totalorder %v23_v7, %v26_v8 }
  0x81   :  { %v36_v10 = vsel %vm27_vm1, %v21_v4, 0.0 }
  0x82   :  { %v37_v11 = vsel %vm28_vm0, %v36_v10, 0.0 }
  0x83   :  { %38 = vadd.xlane.f32.xlu1 %v37_v11 }
  0x87   :  { %34 = vadd.xlane.f32.xlu1 %v33_v12 }
  0xac   :  { %v31_v13 = vpop.xlane.xlu0 %30 }
  0xad   :  { %86 = vrcp.f32 %v31_v13  ;;  %v49_v14 = vadd.f32 1.0, %v31_v13 }
  0xaf   :  { %88 = vrcp.f32 %v49_v14 }
  0xba   :  { %v87_v15 = vpop.eup %86 }
  0xbb   :  { %v42_v18 = vmul.f32 %v87_v15, %v87_v15 }
  0xbc   :  { %v89_v24 = vpop.eup %88 }
 0x10c   :  { %v39_v16 = vpop.xlane.xlu1 %38 }
 0x10d   :  { %v44_v17 = vmul.f32 %v87_v15, %v39_v16 }
 0x10f   :  { %v45_v19 = vmul.f32 2.0, %v44_v17 }
 0x110   :  { %v35_v20 = vpop.xlane.xlu1 %34 }
 0x111   :  { %v46_v21 = vsub.f32 1.0, %v45_v19  ;;  %v43_v22 = vmul.f32 %v42_v18, %v35_v20 }
 0x113   :  { %v48_v23 = vsub.f32 1.0, %v43_v22  ;;  %v47_v25 = vadd.f32 %v46_v21, %v43_v22 }
 0x115   :  { %v51_v26 = vmul.f32 %v89_v24, %v48_v23 }
 0x117   :  { %v52_v27 = vadd.f32 %v51_v26, %v47_v25 }
 0x119   :  { %v55_v28 = vsel %vm54_vm2, %v52_v27, 0.0 }
 0x11a   :  { %56 = vadd.xlane.f32.xlu1 %v55_v28 }
 0x1a3   :  { %v57_v29 = vpop.xlane.xlu1 %56 }
 0x1a4   :  { %v58_v30 = vrot.slane %v57_v29, 4 }
 0x1a6   :  { %v59_v31 = vadd.f32 %v58_v30, %v57_v29 }
 0x1a8   :  { %v60_v32 = vrot.slane %v59_v31, 2 }
 0x1aa   :  { %v61_v33 = vadd.f32 %v60_v32, %v59_v31 }
 0x1ac   :  { %v62_v34 = vrot.slane %v61_v33, 1 }
 0x1ae   :  { %v63_v35 = vadd.f32 %v62_v34, %v61_v33 }
 0x1b0   :  { %81 = vpush %v63_v35 }
 0x1e1   :  { %s82_s13 = spop %81 }
 0x1e2   :  { %v65_v36 = vstv %s82_s13 }
 0x1e3   :  { %66 = vst [vmem:[#allocation2] sm:$0xff] %v65_v36 }
 0x1e4   :  { %101 = shalt.err (!%p98_p4)
}
 0x1e5   :  { %76 = dma.vmem_to_hbm [thread:$0]  %s74_s1, 128, %s140_s2, [#allocation3]  }
 0x1e6   :  { %110 = dma.done.wait [#allocation3], 128  }
 0x1e7   :  { %111 = vsyncadd [#allocation3], 4294967168 }
 0x1e8   :  { %80 = vsyncpa [#allocation3], 1 }

</bundles_post_ra>
